<compile_context>
chip_gen: v7x
topology: tpu7x:2x2x1
jax: 0.10.0
libtpu: 0.0.40
codegen_flags: <defaults>
</compile_context>

<pallas_src>
import jax
import jax.numpy as jnp
from jax.experimental import pallas as pl
from jax.experimental.pallas import tpu as pltpu

B, L, TP1 = 2, 16, 9
T = TP1 - 1
D_SEM, D_ATT, D_BOX, D_EMB = 16, 24, 8, 32
DIN = 2 * D_SEM + 2 * D_ATT + 2 * D_BOX + D_EMB   # 128
H, V = 128, 256
N_ROWS = B * T                                    # 16


def _lm_loss_kernel(x_ref, w1_ref, b1_ref, w2_ref, b2_ref, tm_ref, out_ref):
    # Whole problem in one shot: x is (N_ROWS, DIN) = (16, 128).
    x = x_ref[...]
    h = jnp.tanh(jnp.dot(x, w1_ref[...], preferred_element_type=jnp.float32)
                 + b1_ref[...])                                          # (N, H)
    logits = (jnp.dot(h, w2_ref[...], preferred_element_type=jnp.float32)
              + b2_ref[...])                                             # (N, V)

    # log-sum-exp per row (stable); full logprobs tensor never materialized.
    m = jnp.max(logits, axis=-1, keepdims=True)
    lse = m + jnp.log(jnp.sum(jnp.exp(logits - m), axis=-1, keepdims=True))  # (N, 1)

    tm = tm_ref[...]                      # (N, 2): col 0 = target id (f32), col 1 = mask
    tgt_f = tm[:, 0:1]                    # (N, 1)
    msk = tm[:, 1:2]                      # (N, 1)

    col = jax.lax.broadcasted_iota(jnp.int32, logits.shape, 1).astype(jnp.float32)
    onehot = (col == tgt_f).astype(jnp.float32)                          # (N, V)
    tgt_logit = jnp.sum(logits * onehot, axis=-1, keepdims=True)         # (N, 1)

    nll = (lse - tgt_logit) * msk                                        # (N, 1)
    num = jnp.sum(nll, keepdims=True)                                    # (1, 1)
    den = jnp.sum(msk, keepdims=True)                                    # (1, 1)
    out_ref[...] = num / den


def lm_masked_nll(x, w1, b1, w2, b2, tm):
    # Grid-less single invocation: every operand is a full-array VMEM block
    # (~200 KiB total), output is a (1,1) scalar tile.
    out = pl.pallas_call(
        _lm_loss_kernel,
        out_shape=jax.ShapeDtypeStruct((1, 1), jnp.float32),
        compiler_params=pltpu.CompilerParams(
            allow_input_fusion=[True] * 6),
    )(x, w1, b1, w2, b2, tm)
    return out[0, 0]


def init_params(key):
    ks = jax.random.split(key, 3)
    s = 0.02
    return {
        "emb": s * jax.random.normal(ks[0], (V, D_EMB), jnp.float32),
        "w1": s * jax.random.normal(ks[1], (DIN, H), jnp.float32),
        "b1": jnp.zeros((1, H), jnp.float32),
        "w2": s * jax.random.normal(ks[2], (H, V), jnp.float32),
        "b2": jnp.zeros((1, V), jnp.float32),
    }


def _build_model_inputs(params, semantic_feat, semantic1_feat, att_feats,
                        att1_feats, box_feat, box1_feat, labels, masks):
    b, tp1 = labels.shape
    t = tp1 - 1
    ctx = jnp.concatenate([
        semantic_feat, semantic1_feat,
        jnp.mean(att_feats, axis=1), jnp.mean(att1_feats, axis=1),
        jnp.mean(box_feat, axis=1), jnp.mean(box1_feat, axis=1)], axis=-1)   # (B, 96)
    in_words = labels[:, :-1]                                                # (B, T)
    emb = params["emb"][in_words]                                            # (B, T, D_EMB)
    ctx_bt = jnp.broadcast_to(ctx[:, None, :], (b, t, ctx.shape[-1]))
    x = jnp.concatenate([ctx_bt, emb], axis=-1).reshape(b * t, DIN)
    # Pack target id + mask into one lane-contiguous (N, 2) block -> one DMA.
    targets = labels[:, 1:].reshape(b * t).astype(jnp.float32)
    mask = masks[:, 1:].reshape(b * t).astype(jnp.float32)
    tm = jnp.stack([targets, mask], axis=-1)                                 # (N, 2)
    return x, tm


@jax.jit
def _lm_forward(params, semantic_feat, semantic1_feat, att_feats, att1_feats,
                box_feat, box1_feat, labels, masks):
    x, tm = _build_model_inputs(params, semantic_feat, semantic1_feat,
                                att_feats, att1_feats, box_feat, box1_feat,
                                labels, masks)
    return lm_masked_nll(x, params["w1"], params["b1"], params["w2"],
                         params["b2"], tm)


def loss_wrapper_forward(params, semantic_feat, semantic1_feat, att_feats,
                         att1_feats, box_feat, box1_feat, labels, masks,
                         gts=None, gt_indices=None, sc_flag=False,
                         struc_flag=False):
    # Only the LM-loss branch is implemented (crit == LanguageModelCriterion).
    # TODO(synk): struc_flag / sc_flag branches need autoregressive sampling,
    # beam search and CIDEr-based self-critical rewards (host-side numpy); no
    # clean Pallas equivalent.
    assert (not sc_flag) and (not struc_flag)
    loss = _lm_forward(params, semantic_feat, semantic1_feat, att_feats,
                       att1_feats, box_feat, box1_feat, labels, masks)
    return {"loss": loss}


def _ref_loss(params, x, tm):
    tgt = tm[:, 0:1].astype(jnp.int32)
    msk = tm[:, 1:2]
    h = jnp.tanh(x @ params["w1"] + params["b1"])
    logits = h @ params["w2"] + params["b2"]
    lp = jax.nn.log_softmax(logits, axis=-1)
    tlp = jnp.take_along_axis(lp, tgt, axis=-1)
    return jnp.sum(-tlp * msk) / jnp.sum(msk)


if __name__ == "__main__":
    key = jax.random.PRNGKey(0)
    kp, k1, k2, k3, k4, k5, k6, k7 = jax.random.split(key, 8)
    params = init_params(kp)

    semantic_feat = jax.random.normal(k1, (B, D_SEM), jnp.float32)
    semantic1_feat = jax.random.normal(k2, (B, D_SEM), jnp.float32)
    att_feats = jax.random.normal(k3, (B, L, D_ATT), jnp.float32)
    att1_feats = jax.random.normal(k4, (B, L, D_ATT), jnp.float32)
    box_feat = jax.random.normal(k5, (B, L, D_BOX), jnp.float32)
    box1_feat = jax.random.normal(k6, (B, L, D_BOX), jnp.float32)
    labels = jax.random.randint(k7, (B, TP1), 1, V, dtype=jnp.int32)
    masks = jnp.concatenate(
        [jnp.ones((B, TP1 - 2), jnp.float32), jnp.zeros((B, 2), jnp.float32)],
        axis=1)

    out = loss_wrapper_forward(params, semantic_feat, semantic1_feat,
                               att_feats, att1_feats, box_feat, box1_feat,
                               labels, masks, sc_flag=False, struc_flag=False)
    loss = jax.block_until_ready(out["loss"])

    # sanity check against plain-JAX reference
    x, tm = _build_model_inputs(params, semantic_feat, semantic1_feat,
                                att_feats, att1_feats, box_feat, box1_feat,
                                labels, masks)
    ref = jax.block_until_ready(_ref_loss(params, x, tm))
    assert jnp.allclose(loss, ref, rtol=1e-4, atol=1e-4), (loss, ref)

    print("KERNEL_OK")
</pallas_src>

<mosaic_0001>
module attributes {stable_mosaic.version = 11 : i64} {
  func.func @_lm_loss_kernel(%arg0: memref<16x128xf32, #tpu.memory_space<vmem>>, %arg1: memref<128x128xf32, #tpu.memory_space<vmem>>, %arg2: memref<1x128xf32, #tpu.memory_space<vmem>>, %arg3: memref<128x256xf32, #tpu.memory_space<vmem>>, %arg4: memref<1x256xf32, #tpu.memory_space<vmem>>, %arg5: memref<16x2xf32, #tpu.memory_space<vmem>>, %arg6: memref<1x1xf32, #tpu.memory_space<vmem>>) attributes {dimension_semantics = [], scalar_prefetch = 0 : i64, scratch_operands = 0 : i64, tpu.core_type = #tpu.core_type<tc>} {
    %c0 = arith.constant 0 : index
    %c0_0 = arith.constant 0 : index
    %0 = vector.load %arg0[%c0, %c0_0] : memref<16x128xf32, #tpu.memory_space<vmem>>, vector<16x128xf32>
    %c0_1 = arith.constant 0 : index
    %c0_2 = arith.constant 0 : index
    %1 = vector.load %arg1[%c0_1, %c0_2] : memref<128x128xf32, #tpu.memory_space<vmem>>, vector<128x128xf32>
    %cst = arith.constant dense<0.000000e+00> : vector<16x128xf32>
    %2 = tpu.matmul %0, %1, %cst {dimension_numbers = #tpu.dot_dimension_numbers<[1], [0], [0], [1], [0, 0, 1, 1], [], []>} : vector<16x128xf32>, vector<128x128xf32>, vector<16x128xf32> -> vector<16x128xf32>
    %c0_3 = arith.constant 0 : index
    %c0_4 = arith.constant 0 : index
    %3 = vector.load %arg2[%c0_3, %c0_4] : memref<1x128xf32, #tpu.memory_space<vmem>>, vector<1x128xf32>
    %4 = vector.broadcast %3 : vector<1x128xf32> to vector<16x128xf32>
    %5 = arith.addf %2, %4 : vector<16x128xf32>
    %6 = math.tanh %5 : vector<16x128xf32>
    %c0_5 = arith.constant 0 : index
    %c0_6 = arith.constant 0 : index
    %7 = vector.load %arg3[%c0_5, %c0_6] : memref<128x256xf32, #tpu.memory_space<vmem>>, vector<128x256xf32>
    %cst_7 = arith.constant dense<0.000000e+00> : vector<16x256xf32>
    %8 = tpu.matmul %6, %7, %cst_7 {dimension_numbers = #tpu.dot_dimension_numbers<[1], [0], [0], [1], [0, 0, 1, 1], [], []>} : vector<16x128xf32>, vector<128x256xf32>, vector<16x256xf32> -> vector<16x256xf32>
    %c0_8 = arith.constant 0 : index
    %c0_9 = arith.constant 0 : index
    %9 = vector.load %arg4[%c0_8, %c0_9] : memref<1x256xf32, #tpu.memory_space<vmem>>, vector<1x256xf32>
    %10 = vector.broadcast %9 : vector<1x256xf32> to vector<16x256xf32>
    %11 = arith.addf %8, %10 : vector<16x256xf32>
    %cst_10 = arith.constant dense<0xFF800000> : vector<16xf32>
    %12 = vector.multi_reduction <maximumf>, %11, %cst_10 [1] : vector<16x256xf32> to vector<16xf32>
    %13 = vector.shape_cast %12 : vector<16xf32> to vector<16x1xf32>
    %14 = vector.broadcast %13 : vector<16x1xf32> to vector<16x256xf32>
    %15 = arith.subf %11, %14 : vector<16x256xf32>
    %16 = math.exp %15 : vector<16x256xf32>
    %cst_11 = arith.constant dense<0.000000e+00> : vector<16xf32>
    %17 = vector.multi_reduction <add>, %16, %cst_11 [1] : vector<16x256xf32> to vector<16xf32>
    %18 = vector.shape_cast %17 : vector<16xf32> to vector<16x1xf32>
    %19 = math.log %18 : vector<16x1xf32>
    %20 = arith.addf %13, %19 : vector<16x1xf32>
    %c0_12 = arith.constant 0 : index
    %c0_13 = arith.constant 0 : index
    %21 = vector.load %arg5[%c0_12, %c0_13] : memref<16x2xf32, #tpu.memory_space<vmem>>, vector<16x2xf32>
    %22 = vector.extract_strided_slice %21 {offsets = [0, 0], sizes = [16, 1], strides = [1, 1]} : vector<16x2xf32> to vector<16x1xf32>
    %23 = vector.extract_strided_slice %21 {offsets = [0, 1], sizes = [16, 1], strides = [1, 1]} : vector<16x2xf32> to vector<16x1xf32>
    %24 = tpu.iota {dimensions = array<i32: 1>} : vector<16x256xi32>
    %25 = arith.sitofp %24 : vector<16x256xi32> to vector<16x256xf32>
    %26 = vector.broadcast %22 : vector<16x1xf32> to vector<16x256xf32>
    %27 = arith.cmpf oeq, %25, %26 : vector<16x256xf32>
    %28 = arith.extui %27 : vector<16x256xi1> to vector<16x256xi32>
    %29 = arith.sitofp %28 : vector<16x256xi32> to vector<16x256xf32>
    %30 = arith.mulf %11, %29 : vector<16x256xf32>
    %cst_14 = arith.constant dense<0.000000e+00> : vector<16xf32>
    %31 = vector.multi_reduction <add>, %30, %cst_14 [1] : vector<16x256xf32> to vector<16xf32>
    %32 = vector.shape_cast %31 : vector<16xf32> to vector<16x1xf32>
    %33 = arith.subf %20, %32 : vector<16x1xf32>
    %34 = arith.mulf %33, %23 : vector<16x1xf32>
    %35 = vector.shape_cast %34 : vector<16x1xf32> to vector<1x16x1xf32>
    %cst_15 = arith.constant dense<0.000000e+00> : vector<1xf32>
    %36 = vector.multi_reduction <add>, %35, %cst_15 [1, 2] : vector<1x16x1xf32> to vector<1xf32>
    %37 = vector.shape_cast %36 : vector<1xf32> to vector<1x1x1xf32>
    %38 = vector.extract %37[0, 0, 0] : f32 from vector<1x1x1xf32>
    %39 = vector.broadcast %38 : f32 to vector<1x1xf32>
    %40 = vector.shape_cast %23 : vector<16x1xf32> to vector<1x16x1xf32>
    %cst_16 = arith.constant dense<0.000000e+00> : vector<1xf32>
    %41 = vector.multi_reduction <add>, %40, %cst_16 [1, 2] : vector<1x16x1xf32> to vector<1xf32>
    %42 = vector.shape_cast %41 : vector<1xf32> to vector<1x1x1xf32>
    %43 = vector.extract %42[0, 0, 0] : f32 from vector<1x1x1xf32>
    %44 = vector.broadcast %43 : f32 to vector<1x1xf32>
    %45 = arith.divf %39, %44 : vector<1x1xf32>
    %c0_17 = arith.constant 0 : index
    %c0_18 = arith.constant 0 : index
    %46 = vector.load %arg6[%c0_17, %c0_18] : memref<1x1xf32, #tpu.memory_space<vmem>>, vector<1x1xf32>
    tpu.vector_store %arg6[%c0_17, %c0_18], %45 {strides = array<i32>} : memref<1x1xf32, #tpu.memory_space<vmem>>, vector<1x1xf32>,
    return
  }
}

</mosaic_0001>

<bundles_post_ra>
// kernel: _lm_forward.2
= control target key start
LH: loop header
LB: loop body
LE: loop exit
PB: predicated region body
PF: predicated region fallthrough
CT: control target
= control target key end

     0   :  { %s927_s0 = inlined_call_operand.vmem [shape: f32[128,128], index: 0, kind: input, shape index: {}]   ;;  %s928_s1 = inlined_call_operand.vmem [shape: f32[1,128], index: 1, kind: input, shape index: {}]   ;;  %s929_s2 = inlined_call_operand.vmem [shape: f32[128,256], index: 2, kind: input, shape index: {}]   ;;  %s930_s3 = inlined_call_operand.vmem [shape: f32[1,256], index: 3, kind: input, shape index: {}]   ;;  %s931_s4 = inlined_call_operand.vmem [shape: f32[16,2], index: 4, kind: input, shape index: {}]   ;;  %s932_s5 = inlined_call_operand.vmem [shape: f32[2,8,32], index: 5, kind: input, shape index: {}]   ;;  %s933_s6 = inlined_call_operand.<no memory space> [shape: f32[], index: 6, kind: input, shape index: {}]   ;;  %s934_s7 = inlined_call_operand.vmem [shape: f32[2,8,96], index: 7, kind: input, shape index: {}]   ;;  %s935_s8 = inlined_call_operand.hbm [shape: f32[1,1], index: 8, kind: output, shape index: {}]  }
   0x1   :  { %v711_v0 = vstv %s933_s6 }
   0x2   :  { %v61_v1 = vlaneseq  ;;  %v117_v2 = vld [vmem:[%s927_s0] sm:$0xff]  ;;  %v118_v3 = vld [vmem:[%s927_s0 + $0x8] sm:$0xff]  ;;  %v119_v4 = vld [vmem:[%s927_s0 + $0x10] sm:$0xff]  ;;  %s658_s22 = smov 96  }
   0x3   :  { %v120_v5 = vld [vmem:[%s927_s0 + $0x18] sm:$0xff]  ;;  %v536_v7 = vpack.c.bf16 %v118_v3, %v117_v2  ;;  %v121_v9 = vld [vmem:[%s927_s0 + $0x20] sm:$0xff]  ;;  %v122_v10 = vld [vmem:[%s927_s0 + $0x28] sm:$0xff] }
   0x4   :  { %v726_v6 = vand.u32 127, %v61_v1  ;;  %v540_v8 = vpack.c.bf16 %v120_v5, %v119_v4  ;;  %v60_v11 = vld [vmem:[%s932_s5] sm:$0xff]  ;;  %v476_v13 = vld [vmem:[%s932_s5 + $0x8] sm:$0xff]  ;;  %v544_v14 = vpack.c.bf16 %v122_v10, %v121_v9  ;;  %v123_v15 = vld [vmem:[%s927_s0 + $0x30] sm:$0xff] }
   0x5   :  { %537 = vmatprep.subr.bf16.mxu0 %v536_v7  ;;  %v124_v16 = vld [vmem:[%s927_s0 + $0x38] sm:$0xff]  ;;  %v218_v17 = vld [vmem:[%s929_s2 + $0x8] sm:$0xff]  ;;  %v217_v21 = vld [vmem:[%s929_s2] sm:$0xff] }
   0x6   :  { %v738_v12 = vadd.s32 128, %v726_v6  ;;  %vm68_vm0 = vcmp.lt.s32.totalorder %v726_v6, 32  ;;  %539 = vmatpush3.bf16.msra.mxu0 %v536_v7  ;;  %v220_v20 = vld [vmem:[%s929_s2 + $0x18] sm:$0xff]  ;;  %v219_v22 = vld [vmem:[%s929_s2 + $0x10] sm:$0xff]  ;;  %v222_v27 = vld [vmem:[%s929_s2 + $0x28] sm:$0xff]  ;;  %v548_v35 = vpack.c.bf16 %v124_v16, %v123_v15 }
   0x7   :  { %541 = vmatprep.subr.bf16.mxu0 %v540_v8  ;;  %v568_v25 = vpack.c.bf16 %v220_v20, %v218_v17  ;;  %v570_v26 = vpack.c.bf16 %v219_v22, %v217_v21  ;;  %v224_v28 = vld [vmem:[%s929_s2 + $0x38] sm:$0xff]  ;;  %v221_v29 = vld [vmem:[%s929_s2 + $0x20] sm:$0xff]  ;;  %v223_v32 = vld [vmem:[%s929_s2 + $0x30] sm:$0xff] }
   0x8   :  { %vm64_vm1 = vcmp.lt.s32.totalorder %v738_v12, 160  ;;  %v572_v31 = vpack.c.bf16 %v224_v28, %v222_v27  ;;  %v226_v33 = vld [vmem:[%s929_s2 + $0x48] sm:$0xff]  ;;  %v228_v34 = vld [vmem:[%s929_s2 + $0x58] sm:$0xff]  ;;  %v125_v36 = vld [vmem:[%s927_s0 + $0x40] sm:$0xff]  ;;  %v574_v38 = vpack.c.bf16 %v223_v32, %v221_v29 }
   0x9   :  { %v65_v18 = vsel %vm64_vm1, %v60_v11, %v711_v0  ;;  %v94_v19 = vsel %vm64_vm1, %v476_v13, %v711_v0  ;;  %569 = vmatprep.subr.bf16.mxu1 %v568_v25  ;;  %v126_v37 = vld [vmem:[%s927_s0 + $0x48] sm:$0xff]  ;;  %v576_v39 = vpack.c.bf16 %v228_v34, %v226_v33  ;;  %v225_v40 = vld [vmem:[%s929_s2 + $0x40] sm:$0xff]  ;;  %v227_v41 = vld [vmem:[%s929_s2 + $0x50] sm:$0xff] }
   0xa   :  { %v69_v23 = vsel %vm68_vm0, %v65_v18, %v711_v0  ;;  %v98_v24 = vsel %vm68_vm0, %v94_v19, %v711_v0  ;;  %543 = vmatpush3.bf16.msra.mxu0 %v540_v8  ;;  %571 = vmatpush1.bf16.msra.mxu1 %v570_v26 }
   0xb   :  { %v609_v30 = vpack.i.bf16 %v98_v24, %v69_v23  ;;  %545 = vmatprep.subr.bf16.mxu0 %v544_v14  ;;  %573 = vmatprep.subr.bf16.mxu1 %v572_v31 }
   0xd   :  { %610 = vrot.lane.b32.xlu0 %v609_v30, %s658_s22 }
   0xe   :  { %15 = vsyncpa [#allocation13], 0  ;;  %547 = vmatpush3.bf16.msra.mxu0 %v544_v14  ;;  %v230_v42 = vld [vmem:[%s929_s2 + $0x68] sm:$0xff]  ;;  %v232_v43 = vld [vmem:[%s929_s2 + $0x78] sm:$0xff]  ;;  %v552_v44 = vpack.c.bf16 %v126_v37, %v125_v36  ;;  %575 = vmatpush1.bf16.msra.mxu1 %v574_v38  ;;  %v578_v47 = vpack.c.bf16 %v227_v41, %v225_v40  ;;  %vm76_vm2 = vcmp.lt.s32.totalorder %v726_v6, 96  ;;  %v659_v26 = vmov 0.0  }
   0xf   :  { %549 = vmatprep.subr.bf16.mxu0 %v548_v35  ;;  %v127_v45 = vld [vmem:[%s927_s0 + $0x50] sm:$0xff]  ;;  %v128_v46 = vld [vmem:[%s927_s0 + $0x58] sm:$0xff]  ;;  %577 = vmatprep.subr.bf16.mxu1 %v576_v39  ;;  %v580_v48 = vpack.c.bf16 %v232_v43, %v230_v42  ;;  %v229_v49 = vld [vmem:[%s929_s2 + $0x60] sm:$0xff]  ;;  %v660_v33 = vmov 0   ;;  %v252_v41 = vshrl.u32 %v61_v1, 7  ;;  %vm419_vm7 = vcmask 7168  }
  0x10   :  { %v231_v50 = vld [vmem:[%s929_s2 + $0x70] sm:$0xff]  ;;  %v234_v51 = vld [vmem:[%s929_s2 + $0x88] sm:$0xff]  ;;  %v236_v52 = vld [vmem:[%s929_s2 + $0x98] sm:$0xff]  ;;  %v556_v53 = vpack.c.bf16 %v128_v46, %v127_v45  ;;  %325 = vmatprep.mubr.f32.mxu1 %v659_v26  ;;  %614 = vset.pattern.permute.xlu1 %v660_v33  ;;  %s662_s18 = smov [#allocation12]   ;;  %vm454_vm8 = vcmask 0  }
  0x11   :  { %v129_v54 = vld [vmem:[%s927_s0 + $0x60] sm:$0xff]  ;;  %v130_v55 = vld [vmem:[%s927_s0 + $0x68] sm:$0xff]  ;;  %v582_v56 = vpack.c.bf16 %v231_v50, %v229_v49  ;;  %v584_v57 = vpack.c.bf16 %v236_v52, %v234_v51  ;;  %v131_v59 = vld [vmem:[%s927_s0 + $0x70] sm:$0xff]  ;;  %615 = vset.pattern.permute.xlu0 %v660_v33  ;;  %v253_v42 = vsub.s32 0, %v252_v41  ;;  %s462_s19 = sshll.u32 %s662_s18, 4  ;;  %s463_s19 = int_to_ptr.vmem [resolvable:$true] %s462_s19 }
  0x12   :  { %551 = vmatpush3.bf16.msra.mxu0 %v548_v35  ;;  %579 = vmatpush1.bf16.msra.mxu1 %v578_v47  ;;  %v560_v58 = vpack.c.bf16 %v130_v55, %v129_v54  ;;  %v132_v60 = vld [vmem:[%s927_s0 + $0x78] sm:$0xff]  ;;  %v72_v62 = vld [vmem:[%s934_s7] sm:$0xff]  ;;  %v477_v63 = vld [vmem:[%s934_s7 + $0x8] sm:$0xff]  ;;  %s634_s20 = scalar_lea.vmem %s463_s19, 16  ;;  %s638_s21 = scalar_lea.vmem %s463_s19, 32 }
  0x13   :  { %553 = vmatprep.subr.bf16.mxu0 %v552_v44  ;;  %581 = vmatprep.subr.bf16.mxu1 %v580_v48  ;;  %v564_v61 = vpack.c.bf16 %v132_v60, %v131_v59  ;;  %v77_v3 = vsel %vm76_vm2, %v72_v62, %v711_v0  ;;  %v107_v4 = vsel %vm76_vm2, %v477_v63, %v711_v0  ;;  %v233_v10 = vld [vmem:[%s929_s2 + $0x80] sm:$0xff]  ;;  %v235_v11 = vld [vmem:[%s929_s2 + $0x90] sm:$0xff]  ;;  %v238_v0 = vld [vmem:[%s929_s2 + $0xa8] sm:$0xff]  ;;  %p635_p0 = scmp.ne.s32.totalorder %s463_s19, %s634_s20  ;;  %p639_p1 = scmp.lt.s32.totalorder %s463_s19, %s463_s19 }
  0x14   :  { %v586_v13 = vpack.c.bf16 %v235_v11, %v233_v10  ;;  %v240_v14 = vld [vmem:[%s929_s2 + $0xb8] sm:$0xff]  ;;  %v237_v16 = vld [vmem:[%s929_s2 + $0xa0] sm:$0xff]  ;;  %v239_v17 = vld [vmem:[%s929_s2 + $0xb0] sm:$0xff]  ;;  %p640_p2 = scmp.lt.s32.totalorder %s638_s21, %s634_s20 }
  0x15   :  { %v588_v15 = vpack.c.bf16 %v240_v14, %v238_v0  ;;  %v590_v18 = vpack.c.bf16 %v239_v17, %v237_v16  ;;  %v242_v19 = vld [vmem:[%s929_s2 + $0xc8] sm:$0xff]  ;;  %v244_v20 = vld [vmem:[%s929_s2 + $0xd8] sm:$0xff]  ;;  %v241_v21 = vld [vmem:[%s929_s2 + $0xc0] sm:$0xff] }
  0x16   :  { %555 = vmatpush3.bf16.msra.mxu0 %v552_v44  ;;  %583 = vmatpush1.bf16.msra.mxu1 %v582_v56  ;;  %v592_v22 = vpack.c.bf16 %v244_v20, %v242_v19  ;;  %v243_v23 = vld [vmem:[%s929_s2 + $0xd0] sm:$0xff]  ;;  %v246_v24 = vld [vmem:[%s929_s2 + $0xe8] sm:$0xff]  ;;  %v248_v25 = vld [vmem:[%s929_s2 + $0xf8] sm:$0xff]  ;;  %v257_v44 = vsub.s32 1, %v252_v41  ;;  %p641_p3 = por %p640_p2, %p639_p1 }
  0x17   :  { %557 = vmatprep.subr.bf16.mxu0 %v556_v53  ;;  %585 = vmatprep.subr.bf16.mxu1 %v584_v57  ;;  %v594_v27 = vpack.c.bf16 %v243_v23, %v241_v21  ;;  %v596_v28 = vpack.c.bf16 %v248_v25, %v246_v24  ;;  %v245_v29 = vld [vmem:[%s929_s2 + $0xe0] sm:$0xff]  ;;  %v247_v30 = vld [vmem:[%s929_s2 + $0xf0] sm:$0xff]  ;;  %v902_v1 = vld [vmem:[%s931_s4 + $0x8] sm:$0xff] }
  0x18   :  { %v598_v31 = vpack.c.bf16 %v247_v30, %v245_v29  ;;  %v888_v32 = vld [vmem:[%s931_s4] sm:$0xff]  ;;  %p642_p4 = pnand %p641_p3, %p635_p0 }
  0x19   :  { %377 = vperm.xlu1 %614, %v888_v32   ;;  %v478_v34 = vld [vmem:[%s928_s1] ss:$0 sm:$0xff] }
  0x1a   :  { %559 = vmatpush3.bf16.msra.mxu0 %v556_v53  ;;  %587 = vmatpush1.bf16.msra.mxu1 %v586_v13  ;;  %v249_v43 = vld [vmem:[%s930_s3] sm:$0x3]  ;;  %s661_s3 = smov 127  }
  0x1b   :  { %561 = vmatprep.subr.bf16.mxu0 %v560_v58  ;;  %589 = vmatprep.subr.bf16.mxu1 %v588_v15  ;;  %v254_v45 = vrot.slane %v249_v43, %v253_v42  ;;  %v258_v46 = vrot.slane %v249_v43, %v257_v44 }
  0x1e   :  { %563 = vmatpush3.bf16.msra.mxu0 %v560_v58  ;;  %591 = vmatpush1.bf16.msra.mxu1 %v590_v18 }
  0x1f   :  { %565 = vmatprep.subr.bf16.mxu0 %v564_v61  ;;  %593 = vmatprep.subr.bf16.mxu1 %v592_v22 }
  0x22   :  { %567 = vmatpush3.bf16.msra.mxu0 %v564_v61  ;;  %595 = vmatpush1.bf16.msra.mxu1 %v594_v27 }
  0x23   :  { %597 = vmatprep.subr.bf16.mxu1 %v596_v28 }
  0x26   :  { %599 = vmatpush1.bf16.msra.mxu1 %v598_v31 }
  0x7f   :  { %v611_v2 = vpop.permute.xlu0 %610 }
  0x80   :  { %v613_v5 = vunpack.i.h.bf16 %v611_v2  ;;  %v612_v7 = vunpack.i.l.bf16 %v611_v2 }
  0x82   :  { %v80_v8 = vmax.f32 %v77_v3, %v612_v7  ;;  %v110_v9 = vmax.f32 %v107_v4, %v613_v5  ;;  %v373_v7 = vcvt.s32.f32 %v726_v6 }
  0x84   :  { %533 = vmatprep.mubr.f32.mxu0 %v80_v8  ;;  %v374_v8 = vcvt.s32.f32 %v738_v12 }
  0x85   :  { %534 = vmatmul.mubr.f32.vlgmr.msra.gmra.mrb[0].mxu0 %v110_v9 }
  0x98   :  { %v378_v57 = vpop.permute.xlu1 %377 }
  0x99   :  { %vm385_vm3 = vcmp.eq.f32.partialorder %v373_v7, %v378_v57  ;;  %vm386_vm4 = vcmp.eq.f32.partialorder %v374_v8, %v378_v57 }
  0x9a   :  { %v479_v0 = vsel %vm385_vm3, 1.0, %v659_v26  ;;  %v480_v14 = vsel %vm386_vm4, 1.0, %v659_v26 }
 0x158   :  { %v535_v35 = vpop.f32.mrb[0].mxu0 }
 0x159   :  { %v206_v36 = vpop.f32.mrb[1].mxu0  ;;  %v212_v38 = vadd.f32 %v535_v35, %v478_v34 }
 0x15a   :  { %v207_v37 = vadd.f32 %v478_v34, %v206_v36 }
 0x15c   :  { %616 = vtanh.f32 %v207_v37 }
 0x15d   :  { %618 = vtanh.f32 %v212_v38 }
 0x166   :  { %v617_v39 = vpop.eup %616 }
 0x167   :  { %326 = vmatmul.mubr.f32.vlgmr.msra.gmra.mrb[0].mxu1 %v617_v39  ;;  %v619_v40 = vpop.eup %618 }
 0x168   :  { %331 = vmatprep.mubr.f32.mxu1 %v659_v26 }
 0x16b   :  { %332 = vmatmul.mubr.f32.gmra.mrb[2].mxu1 %v619_v40 }
 0x23a   :  { %v327_v47 = vpop.f32.mrb[0].mxu1 }
 0x23b   :  { %v328_v48 = vadd.f32 %v327_v47, %v254_v45  ;;  %v329_v49 = vpop.f32.mrb[1].mxu1 }
 0x23c   :  { %v330_v50 = vadd.f32 %v329_v49, %v258_v46 }
 0x23d   :  { %v397_v18 = vmul.f32 %v479_v0, %v328_v48 }
 0x23e   :  { %v333_v51 = vpop.f32.mrb[2].mxu1  ;;  %v338_v52 = vmax.f32 %v328_v48, %v330_v50  ;;  %v398_v6 = vmul.f32 %v480_v14, %v330_v50 }
 0x23f   :  { %v334_v53 = vadd.f32 %v333_v51, %v254_v45  ;;  %v335_v54 = vpop.f32.mrb[3].mxu1 }
 0x240   :  { %v336_v55 = vadd.f32 %v335_v54, %v258_v46  ;;  %339 = vmax.xlane.f32.xlu0 %v338_v52  ;;  %v401_v20 = vadd.f32 %v398_v6, %v397_v18 }
 0x242   :  { %v341_v56 = vmax.f32 %v334_v53, %v336_v55 }
 0x244   :  { %342 = vmax.xlane.f32.xlu1 %v341_v56 }
 0x255   :  { %382 = vperm.xlu1 %614, %v902_v1  }
 0x2cd   :  { %v340_v58 = vpop.xlane.xlu0 %339 }
 0x2ce   :  { %v344_v59 = vsub.f32 %v328_v48, %v340_v58  ;;  %v345_v60 = vsub.f32 %v330_v50, %v340_v58 }
 0x2d0   :  { %v348_v61 = vmul.f32 1.442695, %v344_v59  ;;  %v350_v62 = vmul.f32 1.442695, %v345_v60 }
 0x2d1   :  { %v343_v63 = vpop.xlane.xlu1 %342 }
 0x2d2   :  { %620 = vpow2.f32 %v348_v61  ;;  %v346_v2 = vsub.f32 %v334_v53, %v343_v63  ;;  %v347_v3 = vsub.f32 %v336_v55, %v343_v63 }
 0x2d3   :  { %622 = vpow2.f32 %v350_v62 }
 0x2d4   :  { %v352_v4 = vmul.f32 1.442695, %v346_v2  ;;  %v354_v5 = vmul.f32 1.442695, %v347_v3 }
 0x2d5   :  { %v383_v11 = vpop.permute.xlu1 %382 }
 0x2d6   :  { %624 = vpow2.f32 %v352_v4  ;;  %vm387_vm5 = vcmp.eq.f32.partialorder %v373_v7, %v383_v11  ;;  %vm388_vm6 = vcmp.eq.f32.partialorder %v374_v8, %v383_v11 }
 0x2d7   :  { %626 = vpow2.f32 %v354_v5  ;;  %v481_v12 = vsel %vm387_vm5, 1.0, %v659_v26  ;;  %v482_v19 = vsel %vm388_vm6, 1.0, %v659_v26 }
 0x2d8   :  { %v399_v21 = vmul.f32 %v481_v12, %v334_v53  ;;  %v400_v22 = vmul.f32 %v482_v19, %v336_v55 }
 0x2da   :  { %v404_v23 = vadd.f32 %v400_v22, %v399_v21 }
 0x2dc   :  { %v621_v9 = vpop.eup %620 }
 0x2dd   :  { %v623_v10 = vpop.eup %622 }
 0x2de   :  { %v356_v13 = vadd.f32 %v623_v10, %v621_v9 }
 0x2e0   :  { %v625_v15 = vpop.eup %624  ;;  %357 = vadd.xlane.f32.xlu1 %v356_v13 }
 0x2e1   :  { %v627_v16 = vpop.eup %626 }
 0x2e2   :  { %v359_v17 = vadd.f32 %v627_v16, %v625_v15 }
 0x2e4   :  { %360 = vadd.xlane.f32.xlu0 %v359_v17 }
 0x2e8   :  { %402 = vadd.xlane.f32.xlu0 %v401_v20 }
 0x2ec   :  { %405 = vadd.xlane.f32.xlu0 %v404_v23 }
 0x36d   :  { %v358_v24 = vpop.xlane.xlu1 %357 }
 0x36e   :  { %628 = vlog2.f32 %v358_v24 }
 0x371   :  { %v361_v25 = vpop.xlane.xlu0 %360 }
 0x372   :  { %630 = vlog2.f32 %v361_v25 }
 0x375   :  { %v403_v29 = vpop.xlane.xlu0 %402 }
 0x378   :  { %v629_v27 = vpop.eup %628 }
 0x379   :  { %v363_v28 = vmul.f32 0.6931472, %v629_v27  ;;  %v406_v36 = vpop.xlane.xlu0 %405 }
 0x37b   :  { %v366_v30 = vadd.f32 %v363_v28, %v340_v58 }
 0x37c   :  { %v631_v31 = vpop.eup %630 }
 0x37d   :  { %v365_v33 = vmul.f32 0.6931472, %v631_v31  ;;  %v407_v34 = vsub.f32 %v366_v30, %v403_v29 }
 0x37f   :  { %v409_v26 = vmul.f32 %v407_v34, %v888_v32  ;;  %v367_v35 = vadd.f32 %v365_v33, %v343_v63 }
 0x381   :  { %v408_v37 = vsub.f32 %v367_v35, %v406_v36  ;;  %413 = vrot.lane.b32.xlu0 %v409_v26, %s661_s3 }
 0x383   :  { %v410_v38 = vmul.f32 %v408_v37, %v902_v1 }
 0x385   :  { %433 = vrot.lane.b32.xlu0 %v888_v32, %s661_s3  ;;  %415 = vrot.lane.b32.xlu1 %v410_v38, %s661_s3 }
 0x389   :  { %435 = vrot.lane.b32.xlu0 %v902_v1, %s661_s3 }
 0x3f3   :  { %v414_v39 = vpop.permute.xlu0 %413 }
 0x3f4   :  { %v420_v42 = vsel %vm419_vm7, %v414_v39, 0.0 }
 0x3f7   :  { %v416_v40 = vpop.permute.xlu1 %415  ;;  %v434_v41 = vpop.permute.xlu0 %433 }
 0x3f8   :  { %v421_v43 = vsel %vm419_vm7, %v416_v40, 0.0  ;;  %v439_v46 = vsel %vm419_vm7, %v434_v41, 0.0 }
 0x3f9   :  { %v422_v44 = vadd.f32 %v421_v43, %v420_v42 }
 0x3fb   :  { %423 = vadd.xlane.f32.xlu0 %v422_v44  ;;  %v436_v45 = vpop.permute.xlu0 %435 }
 0x3fc   :  { %v440_v47 = vsel %vm419_vm7, %v436_v45, 0.0 }
 0x3fd   :  { %v441_v48 = vadd.f32 %v440_v47, %v439_v46 }
 0x3ff   :  { %442 = vadd.xlane.f32.xlu1 %v441_v48 }
 0x488   :  { %v424_v49 = vpop.xlane.xlu0 %423 }
 0x489   :  { %v425_v50 = vrot.slane %v424_v49, 4 }
 0x48b   :  { %v426_v51 = vadd.f32 %v425_v50, %v424_v49 }
 0x48c   :  { %v443_v32 = vpop.xlane.xlu1 %442 }
 0x48d   :  { %v427_v52 = vrot.slane %v426_v51, 2  ;;  %v444_v53 = vrot.slane %v443_v32, 4 }
 0x48f   :  { %v445_v54 = vadd.f32 %v444_v53, %v443_v32  ;;  %v428_v55 = vadd.f32 %v427_v52, %v426_v51 }
 0x491   :  { %v446_v56 = vrot.slane %v445_v54, 2  ;;  %v429_v1 = vrot.slane %v428_v55, 1 }
 0x493   :  { %v447_v57 = vadd.f32 %v446_v56, %v445_v54  ;;  %v430_v58 = vadd.f32 %v429_v1, %v428_v55 }
 0x495   :  { %600 = vpush %v430_v58  ;;  %v448_v59 = vrot.slane %v447_v57, 1 }
 0x497   :  { %v449_v60 = vadd.f32 %v448_v59, %v447_v57 }
 0x499   :  { %602 = vpush %v449_v60 }
 0x4c6   :  { %s601_s4 = spop %600 }
 0x4c7   :  { %v432_v63 = vstv %s601_s4 }
 0x4ca   :  { %s603_s17 = spop %602 }
 0x4cb   :  { %v451_v61 = vstv %s603_s17 }
 0x4cc   :  { %632 = vrcp.f32 %v451_v61 }
 0x4d6   :  { %v633_v62 = vpop.eup %632 }
 0x4d7   :  { %v453_v2 = vmul.f32 %v633_v62, %v432_v63 }
 0x4d9   :  { %455 = vst.msk [vmem:[#allocation12] sm:$0x1] %vm454_vm8, %v453_v2 }
 0x4da   :  { %645 = shalt.err (!%p642_p4)
}
 0x4db   :  { %s646_s24 = scalar_lea.hbm %s935_s8, 16 }
 0x4dc   :  { %p647_p5 = scmp.ne.s32.totalorder %s935_s8, %s646_s24  ;;  %p650_p6 = scmp.lt.u32.totalorder %s646_s24, %s935_s8 }
 0x4de   :  { %p652_p7 = pnand %p650_p6, %p647_p5 }
 0x4e0   :  { %655 = shalt.err (!%p652_p7)
}
 0x4e1   :  { %465 = dma.vmem_to_hbm [thread:$0]  %s463_s19, 16, %s935_s8, [#allocation13]  }
 0x4e2   :  { %656 = dma.done.wait [#allocation13], 16  }
 0x4e3   :  { %657 = vsyncadd [#allocation13], 4294967280 }
 0x4e4   :  { %469 = vsyncpa [#allocation13], 1 }

</bundles_post_ra>
